<compile_context>
chip_gen: v7x
topology: tpu7x:2x2x1
jax: 0.10.0
libtpu: 0.0.40
codegen_flags: <defaults>
</compile_context>

<pallas_src>
import functools

import jax
import jax.numpy as jnp
import numpy as np
from jax.experimental import pallas as pl
from jax.experimental.pallas import tpu as pltpu


# ----------------------------------------------------------------------------
# Fused Pallas kernel: all TemporalBlocks + final Linear, one grid step.
# ----------------------------------------------------------------------------
def _tcn_fused_kernel(*refs, cfg, B, T, L, k):
    """Whole TCN forward for the full (lane-folded) batch.

    refs = (x, [w1, b1, w2, b2, (wd, bd)] * n_blocks, lin_w, lin_b, out)
      x     : (C_in, L)   lane = b*T + t, zero-padded to L lanes
      w1    : (k, C_out, C_in)    tap j == PyTorch conv1.weight[:, :, j]
      b1    : (C_out, 1)
      w2    : (k, C_out, C_out)
      b2    : (C_out, 1)
      wd,bd : (C_out, C_in), (C_out, 1)   1x1 downsample (only if present)
      lin_w : (O, C_last)                 PyTorch Linear weight layout
      lin_b : (O, 1)
      out   : (O, B)
    """
    it = iter(refs)
    x_ref = next(it)

    # lane -> time-within-batch index; hoisted once and reused for all masks.
    t_in = jax.lax.broadcasted_iota(jnp.int32, (1, L), 1) % T
    shift_amts = sorted({(k - 1 - j) * blk["dilation"]
                         for blk in cfg for j in range(k)} - {0})
    masks = {s: t_in >= s for s in shift_amts}

    def shift(v, s):
        # Causal delay by s steps within each batch segment (zeros flow in).
        if s == 0:
            return v
        rolled = pltpu.roll(v, shift=s, axis=1)       # lane rotate (XLU slot)
        return jnp.where(masks[s], rolled, 0.0)       # kill cross-batch wrap

    def conv(w_ref, b_ref, v, d):
        # Dilated causal conv == sum of k time-shifted 1x1 matmuls (MXU).
        acc = None
        for j in range(k):
            p = jnp.dot(w_ref[j], shift(v, (k - 1 - j) * d),
                        preferred_element_type=jnp.float32)
            acc = p if acc is None else acc + p
        return acc + b_ref[...]

    a = x_ref[...]                                    # (C_in, L), f32
    for blk in cfg:
        w1_ref, b1_ref, w2_ref, b2_ref = next(it), next(it), next(it), next(it)
        wd_ref = bd_ref = None
        if blk["has_down"]:
            wd_ref, bd_ref = next(it), next(it)
        d = blk["dilation"]
        # conv1 -> ReLU -> conv2 -> ReLU   (dropout == identity at inference)
        h = jnp.maximum(conv(w1_ref, b1_ref, a, d), 0.0)
        h = jnp.maximum(conv(w2_ref, b2_ref, h, d), 0.0)
        # residual (+ optional 1x1 downsample) and final ReLU
        res = (jnp.dot(wd_ref[...], a, preferred_element_type=jnp.float32)
               + bd_ref[...]) if blk["has_down"] else a
        a = jnp.maximum(h + res, 0.0)                 # (C_out, L)

    lin_w_ref, lin_b_ref, o_ref = next(it), next(it), next(it)
    # Pick lane b*T + (T-1) of every batch segment with a 0/1 selector matmul
    # (no unaligned lane slicing / gather).
    row = jax.lax.broadcasted_iota(jnp.int32, (L, B), 0)
    col = jax.lax.broadcasted_iota(jnp.int32, (L, B), 1)
    sel = (row == col * T + (T - 1)).astype(jnp.float32)             # (L, B)
    last = jnp.dot(a, sel, preferred_element_type=jnp.float32)       # (C, B)
    y = jnp.dot(lin_w_ref[...], last,
                preferred_element_type=jnp.float32) + lin_b_ref[...]  # (O, B)
    o_ref[...] = y.astype(o_ref.dtype)


# ----------------------------------------------------------------------------
# Wrapper: single pallas_call for the whole network.
# ----------------------------------------------------------------------------
def tcn_forward(params, x_nct, kernel_size):
    """TCN forward (inference).  x_nct: (B, C_in, T) NCW.  Returns (B, O)."""
    B, C_in, T = x_nct.shape
    BT = B * T
    L = max(128, ((BT + 127) // 128) * 128)           # lane-dense vreg rows
    # Fold batch onto the lane axis (lane = b*T + t); zero-pad lanes to L.
    x_fold = jnp.transpose(x_nct, (1, 0, 2)).reshape(C_in, BT).astype(jnp.float32)
    x_fold = jnp.pad(x_fold, ((0, 0), (0, L - BT)))

    cfg = []
    args = [x_fold]
    in_specs = [pl.BlockSpec((C_in, L), lambda i: (0, 0))]
    for li, blk in enumerate(params["blocks"]):
        has_down = "wd" in blk
        cfg.append({"dilation": 2 ** li, "has_down": has_down})
        names = ["w1", "b1", "w2", "b2"] + (["wd", "bd"] if has_down else [])
        for n in names:
            args.append(blk[n])
            in_specs.append(pl.BlockSpec(
                blk[n].shape,
                (lambda i: (0, 0, 0)) if blk[n].ndim == 3 else (lambda i: (0, 0))))
    O = params["lin_w"].shape[0]
    for n in ("lin_w", "lin_b"):
        args.append(params[n])
        in_specs.append(pl.BlockSpec(params[n].shape, lambda i: (0, 0)))

    kernel = functools.partial(_tcn_fused_kernel, cfg=tuple(cfg),
                               B=B, T=T, L=L, k=kernel_size)
    y_ob = pl.pallas_call(
        kernel,
        out_shape=jax.ShapeDtypeStruct((O, B), jnp.float32),
        grid=(1,),
        in_specs=in_specs,
        out_specs=pl.BlockSpec((O, B), lambda i: (0, 0)),
        compiler_params=pltpu.CompilerParams(
            dimension_semantics=("arbitrary",)),
    )(*args)
    return y_ob.T                                     # (B, O)


# ----------------------------------------------------------------------------
# Parameter init (PyTorch-default-style uniform(+-1/sqrt(fan_in))).
# ----------------------------------------------------------------------------
def _uniform(key, shape, bound):
    return jax.random.uniform(key, shape, jnp.float32, -bound, bound)


def init_tcn_params(key, num_inputs, num_channels, out_channel, kernel_size):
    """Conv weights stored per tap as (k, C_out, C_in); w[j] == torch W[:, :, j]."""
    params = {"blocks": []}
    in_ch = num_inputs
    for out_ch in num_channels:
        key, k1, k2, k3, k4, k5, k6 = jax.random.split(key, 7)
        b1 = 1.0 / (in_ch * kernel_size) ** 0.5
        b2 = 1.0 / (out_ch * kernel_size) ** 0.5
        blk = {
            "w1": _uniform(k1, (kernel_size, out_ch, in_ch), b1),
            "b1": _uniform(k2, (out_ch, 1), b1),
            "w2": _uniform(k3, (kernel_size, out_ch, out_ch), b2),
            "b2": _uniform(k4, (out_ch, 1), b2),
        }
        if in_ch != out_ch:                            # 1x1 downsample conv
            bd = 1.0 / in_ch ** 0.5
            blk["wd"] = _uniform(k5, (out_ch, in_ch), bd)
            blk["bd"] = _uniform(k6, (out_ch, 1), bd)
        params["blocks"].append(blk)
        in_ch = out_ch
    key, kl1, kl2 = jax.random.split(key, 3)
    bl = 1.0 / num_channels[-1] ** 0.5
    params["lin_w"] = _uniform(kl1, (out_channel, num_channels[-1]), bl)
    params["lin_b"] = _uniform(kl2, (out_channel, 1), bl)
    return params


# ----------------------------------------------------------------------------
# Pure-JAX reference with exact PyTorch semantics (pad both sides + Chomp1d).
# ----------------------------------------------------------------------------
def tcn_reference(params, x_nct):
    hp = jax.lax.Precision.HIGHEST
    a = x_nct.astype(jnp.float32)
    T = a.shape[-1]
    for li, blk in enumerate(params["blocks"]):
        d = 2 ** li

        def conv(v, w_taps, b, d=d):
            w = jnp.transpose(w_taps, (1, 2, 0))       # (C_out, C_in, k)
            pad = (w.shape[-1] - 1) * d
            y = jax.lax.conv_general_dilated(
                v, w, window_strides=(1,), padding=[(pad, pad)],
                rhs_dilation=(d,), dimension_numbers=("NCH", "OIH", "NCH"),
                precision=hp)
            return y[:, :, :T] + b[None, :, :]         # Chomp1d + bias

        h = jax.nn.relu(conv(a, blk["w1"], blk["b1"]))
        h = jax.nn.relu(conv(h, blk["w2"], blk["b2"]))
        if "wd" in blk:
            res = (jnp.einsum("oc,bct->bot", blk["wd"], a, precision=hp)
                   + blk["bd"][None, :, :])
        else:
            res = a
        a = jax.nn.relu(h + res)
    last = a[:, :, -1]                                  # (B, C_last)
    return (jnp.dot(last, params["lin_w"].T, precision=hp)
            + params["lin_b"][:, 0][None, :])


# ----------------------------------------------------------------------------
if __name__ == "__main__":
    key = jax.random.PRNGKey(0)
    key_p, key_x = jax.random.split(key)

    B, T = 2, 16
    num_inputs = 4
    num_channels = [8, 8]
    out_channel = 3
    kernel_size = 2

    params = init_tcn_params(key_p, num_inputs, num_channels, out_channel,
                             kernel_size)
    x = jax.random.normal(key_x, (B, num_inputs, T), jnp.float32)   # NCW

    y = tcn_forward(params, x, kernel_size)
    jax.block_until_ready(y)
    assert y.shape == (B, out_channel), y.shape

    # Numerical check against the PyTorch-semantics reference (tolerance covers
    # MXU vs. XLA f32 matmul precision differences).
    y_ref = tcn_reference(params, x)
    np.testing.assert_allclose(np.asarray(y), np.asarray(y_ref),
                               rtol=1e-2, atol=1e-2)
    print("KERNEL_OK")
</pallas_src>

<mosaic_0001>
module attributes {stable_mosaic.version = 11 : i64} {
  func.func @_tcn_fused_kernel(%arg0: i32, %arg1: memref<4x128xf32, #tpu.memory_space<vmem>>, %arg2: memref<2x8x4xf32, #tpu.memory_space<vmem>>, %arg3: memref<8x1xf32, #tpu.memory_space<vmem>>, %arg4: memref<2x8x8xf32, #tpu.memory_space<vmem>>, %arg5: memref<8x1xf32, #tpu.memory_space<vmem>>, %arg6: memref<8x4xf32, #tpu.memory_space<vmem>>, %arg7: memref<8x1xf32, #tpu.memory_space<vmem>>, %arg8: memref<2x8x8xf32, #tpu.memory_space<vmem>>, %arg9: memref<8x1xf32, #tpu.memory_space<vmem>>, %arg10: memref<2x8x8xf32, #tpu.memory_space<vmem>>, %arg11: memref<8x1xf32, #tpu.memory_space<vmem>>, %arg12: memref<3x8xf32, #tpu.memory_space<vmem>>, %arg13: memref<3x1xf32, #tpu.memory_space<vmem>>, %arg14: memref<3x2xf32, #tpu.memory_space<vmem>>) attributes {dimension_semantics = [#tpu.dimension_semantics<arbitrary>], iteration_bounds = array<i64: 1>, scalar_prefetch = 0 : i64, scratch_operands = 0 : i64, tpu.core_type = #tpu.core_type<tc>, window_params = [{pipeline_mode = #tpu.pipeline_mode<synchronous>, transform_indices = @transform_0, window_bounds = array<i64: 4, 128>}, {pipeline_mode = #tpu.pipeline_mode<synchronous>, transform_indices = @transform_1, window_bounds = array<i64: 2, 8, 4>}, {pipeline_mode = #tpu.pipeline_mode<synchronous>, transform_indices = @transform_2, window_bounds = array<i64: 8, 1>}, {pipeline_mode = #tpu.pipeline_mode<synchronous>, transform_indices = @transform_3, window_bounds = array<i64: 2, 8, 8>}, {pipeline_mode = #tpu.pipeline_mode<synchronous>, transform_indices = @transform_4, window_bounds = array<i64: 8, 1>}, {pipeline_mode = #tpu.pipeline_mode<synchronous>, transform_indices = @transform_5, window_bounds = array<i64: 8, 4>}, {pipeline_mode = #tpu.pipeline_mode<synchronous>, transform_indices = @transform_6, window_bounds = array<i64: 8, 1>}, {pipeline_mode = #tpu.pipeline_mode<synchronous>, transform_indices = @transform_7, window_bounds = array<i64: 2, 8, 8>}, {pipeline_mode = #tpu.pipeline_mode<synchronous>, transform_indices = @transform_8, window_bounds = array<i64: 8, 1>}, {pipeline_mode = #tpu.pipeline_mode<synchronous>, transform_indices = @transform_9, window_bounds = array<i64: 2, 8, 8>}, {pipeline_mode = #tpu.pipeline_mode<synchronous>, transform_indices = @transform_10, window_bounds = array<i64: 8, 1>}, {pipeline_mode = #tpu.pipeline_mode<synchronous>, transform_indices = @transform_11, window_bounds = array<i64: 3, 8>}, {pipeline_mode = #tpu.pipeline_mode<synchronous>, transform_indices = @transform_12, window_bounds = array<i64: 3, 1>}, {pipeline_mode = #tpu.pipeline_mode<synchronous>, transform_indices = @transform_13, window_bounds = array<i64: 3, 2>}]} {
    %0 = tpu.iota {dimensions = array<i32: 1>} : vector<1x128xi32>
    %c16_i32 = arith.constant 16 : i32
    %c0_i32 = arith.constant 0 : i32
    %1 = arith.cmpi eq, %c16_i32, %c0_i32 : i32
    %c1_i32 = arith.constant 1 : i32
    %2 = arith.select %1, %c1_i32, %c16_i32 : i32
    %3 = vector.broadcast %2 : i32 to vector<1x128xi32>
    %4 = arith.remsi %0, %3 : vector<1x128xi32>
    %c0_i32_0 = arith.constant 0 : i32
    %5 = vector.broadcast %c0_i32_0 : i32 to vector<1x128xi32>
    %6 = arith.cmpi ne, %4, %5 : vector<1x128xi32>
    %c0_i32_1 = arith.constant 0 : i32
    %7 = vector.broadcast %c0_i32_1 : i32 to vector<1x128xi32>
    %8 = arith.cmpi slt, %4, %7 : vector<1x128xi32>
    %c0_i32_2 = arith.constant 0 : i32
    %9 = arith.cmpi slt, %2, %c0_i32_2 : i32
    %10 = vector.broadcast %9 : i1 to vector<1x128xi1>
    %11 = vector.broadcast %10 : vector<1x128xi1> to vector<1x128xi1>
    %12 = arith.xori %8, %11 : vector<1x128xi1>
    %13 = arith.andi %12, %6 : vector<1x128xi1>
    %14 = vector.broadcast %2 : i32 to vector<1x128xi32>
    %15 = arith.addi %4, %14 : vector<1x128xi32>
    %16 = arith.select %13, %15, %4 : vector<1x128xi1>, vector<1x128xi32>
    %c1_i32_3 = arith.constant 1 : i32
    %17 = vector.broadcast %c1_i32_3 : i32 to vector<1x128xi32>
    %18 = arith.cmpi sge, %16, %17 : vector<1x128xi32>
    %c2_i32 = arith.constant 2 : i32
    %19 = vector.broadcast %c2_i32 : i32 to vector<1x128xi32>
    %20 = arith.cmpi sge, %16, %19 : vector<1x128xi32>
    %c0 = arith.constant 0 : index
    %c0_4 = arith.constant 0 : index
    %21 = vector.load %arg1[%c0, %c0_4] : memref<4x128xf32, #tpu.memory_space<vmem>>, vector<4x128xf32>
    %c0_5 = arith.constant 0 : index
    %c0_6 = arith.constant 0 : index
    %c0_7 = arith.constant 0 : index
    %22 = vector.load %arg2[%c0_5, %c0_6, %c0_7] : memref<2x8x4xf32, #tpu.memory_space<vmem>>, vector<1x8x4xf32>
    %23 = vector.shape_cast %22 : vector<1x8x4xf32> to vector<8x4xf32>
    %c1_i32_8 = arith.constant 1 : i32
    %24 = tpu.dynamic_rotate %21 by %c1_i32_8 dim 1 : vector<4x128xf32>, i32 -> vector<4x128xf32>
    %cst = arith.constant 0.000000e+00 : f32
    %25 = vector.shape_cast %18 : vector<1x128xi1> to vector<1x128xi1>
    %26 = vector.broadcast %25 : vector<1x128xi1> to vector<4x128xi1>
    %27 = vector.broadcast %cst : f32 to vector<4x128xf32>
    %28 = arith.select %26, %24, %27 : vector<4x128xi1>, vector<4x128xf32>
    %cst_9 = arith.constant dense<0.000000e+00> : vector<8x128xf32>
    %29 = tpu.matmul %23, %28, %cst_9 {dimension_numbers = #tpu.dot_dimension_numbers<[1], [0], [0], [1], [0, 0, 1, 1], [], []>} : vector<8x4xf32>, vector<4x128xf32>, vector<8x128xf32> -> vector<8x128xf32>
    %c1 = arith.constant 1 : index
    %c0_10 = arith.constant 0 : index
    %c0_11 = arith.constant 0 : index
    %30 = vector.load %arg2[%c1, %c0_10, %c0_11] : memref<2x8x4xf32, #tpu.memory_space<vmem>>, vector<1x8x4xf32>
    %31 = vector.shape_cast %30 : vector<1x8x4xf32> to vector<8x4xf32>
    %cst_12 = arith.constant dense<0.000000e+00> : vector<8x128xf32>
    %32 = tpu.matmul %31, %21, %cst_12 {dimension_numbers = #tpu.dot_dimension_numbers<[1], [0], [0], [1], [0, 0, 1, 1], [], []>} : vector<8x4xf32>, vector<4x128xf32>, vector<8x128xf32> -> vector<8x128xf32>
    %33 = arith.addf %29, %32 : vector<8x128xf32>
    %c0_13 = arith.constant 0 : index
    %c0_14 = arith.constant 0 : index
    %34 = vector.load %arg3[%c0_13, %c0_14] : memref<8x1xf32, #tpu.memory_space<vmem>>, vector<8x1xf32>
    %35 = vector.broadcast %34 : vector<8x1xf32> to vector<8x128xf32>
    %36 = arith.addf %33, %35 : vector<8x128xf32>
    %cst_15 = arith.constant 0.000000e+00 : f32
    %37 = vector.broadcast %cst_15 : f32 to vector<8x128xf32>
    %38 = arith.maximumf %36, %37 : vector<8x128xf32>
    %c0_16 = arith.constant 0 : index
    %c0_17 = arith.constant 0 : index
    %c0_18 = arith.constant 0 : index
    %39 = vector.load %arg4[%c0_16, %c0_17, %c0_18] : memref<2x8x8xf32, #tpu.memory_space<vmem>>, vector<1x8x8xf32>
    %40 = vector.shape_cast %39 : vector<1x8x8xf32> to vector<8x8xf32>
    %c1_i32_19 = arith.constant 1 : i32
    %41 = tpu.dynamic_rotate %38 by %c1_i32_19 dim 1 : vector<8x128xf32>, i32 -> vector<8x128xf32>
    %cst_20 = arith.constant 0.000000e+00 : f32
    %42 = vector.shape_cast %18 : vector<1x128xi1> to vector<1x128xi1>
    %43 = vector.broadcast %42 : vector<1x128xi1> to vector<8x128xi1>
    %44 = vector.broadcast %cst_20 : f32 to vector<8x128xf32>
    %45 = arith.select %43, %41, %44 : vector<8x128xi1>, vector<8x128xf32>
    %cst_21 = arith.constant dense<0.000000e+00> : vector<8x128xf32>
    %46 = tpu.matmul %40, %45, %cst_21 {dimension_numbers = #tpu.dot_dimension_numbers<[1], [0], [0], [1], [0, 0, 1, 1], [], []>} : vector<8x8xf32>, vector<8x128xf32>, vector<8x128xf32> -> vector<8x128xf32>
    %c1_22 = arith.constant 1 : index
    %c0_23 = arith.constant 0 : index
    %c0_24 = arith.constant 0 : index
    %47 = vector.load %arg4[%c1_22, %c0_23, %c0_24] : memref<2x8x8xf32, #tpu.memory_space<vmem>>, vector<1x8x8xf32>
    %48 = vector.shape_cast %47 : vector<1x8x8xf32> to vector<8x8xf32>
    %cst_25 = arith.constant dense<0.000000e+00> : vector<8x128xf32>
    %49 = tpu.matmul %48, %38, %cst_25 {dimension_numbers = #tpu.dot_dimension_numbers<[1], [0], [0], [1], [0, 0, 1, 1], [], []>} : vector<8x8xf32>, vector<8x128xf32>, vector<8x128xf32> -> vector<8x128xf32>
    %50 = arith.addf %46, %49 : vector<8x128xf32>
    %c0_26 = arith.constant 0 : index
    %c0_27 = arith.constant 0 : index
    %51 = vector.load %arg5[%c0_26, %c0_27] : memref<8x1xf32, #tpu.memory_space<vmem>>, vector<8x1xf32>
    %52 = vector.broadcast %51 : vector<8x1xf32> to vector<8x128xf32>
    %53 = arith.addf %50, %52 : vector<8x128xf32>
    %cst_28 = arith.constant 0.000000e+00 : f32
    %54 = vector.broadcast %cst_28 : f32 to vector<8x128xf32>
    %55 = arith.maximumf %53, %54 : vector<8x128xf32>
    %c0_29 = arith.constant 0 : index
    %c0_30 = arith.constant 0 : index
    %56 = vector.load %arg6[%c0_29, %c0_30] : memref<8x4xf32, #tpu.memory_space<vmem>>, vector<8x4xf32>
    %cst_31 = arith.constant dense<0.000000e+00> : vector<8x128xf32>
    %57 = tpu.matmul %56, %21, %cst_31 {dimension_numbers = #tpu.dot_dimension_numbers<[1], [0], [0], [1], [0, 0, 1, 1], [], []>} : vector<8x4xf32>, vector<4x128xf32>, vector<8x128xf32> -> vector<8x128xf32>
    %c0_32 = arith.constant 0 : index
    %c0_33 = arith.constant 0 : index
    %58 = vector.load %arg7[%c0_32, %c0_33] : memref<8x1xf32, #tpu.memory_space<vmem>>, vector<8x1xf32>
    %59 = vector.broadcast %58 : vector<8x1xf32> to vector<8x128xf32>
    %60 = arith.addf %57, %59 : vector<8x128xf32>
    %61 = arith.addf %55, %60 : vector<8x128xf32>
    %cst_34 = arith.constant 0.000000e+00 : f32
    %62 = vector.broadcast %cst_34 : f32 to vector<8x128xf32>
    %63 = arith.maximumf %61, %62 : vector<8x128xf32>
    %c0_35 = arith.constant 0 : index
    %c0_36 = arith.constant 0 : index
    %c0_37 = arith.constant 0 : index
    %64 = vector.load %arg8[%c0_35, %c0_36, %c0_37] : memref<2x8x8xf32, #tpu.memory_space<vmem>>, vector<1x8x8xf32>
    %65 = vector.shape_cast %64 : vector<1x8x8xf32> to vector<8x8xf32>
    %c2_i32_38 = arith.constant 2 : i32
    %66 = tpu.dynamic_rotate %63 by %c2_i32_38 dim 1 : vector<8x128xf32>, i32 -> vector<8x128xf32>
    %cst_39 = arith.constant 0.000000e+00 : f32
    %67 = vector.shape_cast %20 : vector<1x128xi1> to vector<1x128xi1>
    %68 = vector.broadcast %67 : vector<1x128xi1> to vector<8x128xi1>
    %69 = vector.broadcast %cst_39 : f32 to vector<8x128xf32>
    %70 = arith.select %68, %66, %69 : vector<8x128xi1>, vector<8x128xf32>
    %cst_40 = arith.constant dense<0.000000e+00> : vector<8x128xf32>
    %71 = tpu.matmul %65, %70, %cst_40 {dimension_numbers = #tpu.dot_dimension_numbers<[1], [0], [0], [1], [0, 0, 1, 1], [], []>} : vector<8x8xf32>, vector<8x128xf32>, vector<8x128xf32> -> vector<8x128xf32>
    %c1_41 = arith.constant 1 : index
    %c0_42 = arith.constant 0 : index
    %c0_43 = arith.constant 0 : index
    %72 = vector.load %arg8[%c1_41, %c0_42, %c0_43] : memref<2x8x8xf32, #tpu.memory_space<vmem>>, vector<1x8x8xf32>
    %73 = vector.shape_cast %72 : vector<1x8x8xf32> to vector<8x8xf32>
    %cst_44 = arith.constant dense<0.000000e+00> : vector<8x128xf32>
    %74 = tpu.matmul %73, %63, %cst_44 {dimension_numbers = #tpu.dot_dimension_numbers<[1], [0], [0], [1], [0, 0, 1, 1], [], []>} : vector<8x8xf32>, vector<8x128xf32>, vector<8x128xf32> -> vector<8x128xf32>
    %75 = arith.addf %71, %74 : vector<8x128xf32>
    %c0_45 = arith.constant 0 : index
    %c0_46 = arith.constant 0 : index
    %76 = vector.load %arg9[%c0_45, %c0_46] : memref<8x1xf32, #tpu.memory_space<vmem>>, vector<8x1xf32>
    %77 = vector.broadcast %76 : vector<8x1xf32> to vector<8x128xf32>
    %78 = arith.addf %75, %77 : vector<8x128xf32>
    %cst_47 = arith.constant 0.000000e+00 : f32
    %79 = vector.broadcast %cst_47 : f32 to vector<8x128xf32>
    %80 = arith.maximumf %78, %79 : vector<8x128xf32>
    %c0_48 = arith.constant 0 : index
    %c0_49 = arith.constant 0 : index
    %c0_50 = arith.constant 0 : index
    %81 = vector.load %arg10[%c0_48, %c0_49, %c0_50] : memref<2x8x8xf32, #tpu.memory_space<vmem>>, vector<1x8x8xf32>
    %82 = vector.shape_cast %81 : vector<1x8x8xf32> to vector<8x8xf32>
    %c2_i32_51 = arith.constant 2 : i32
    %83 = tpu.dynamic_rotate %80 by %c2_i32_51 dim 1 : vector<8x128xf32>, i32 -> vector<8x128xf32>
    %cst_52 = arith.constant 0.000000e+00 : f32
    %84 = vector.shape_cast %20 : vector<1x128xi1> to vector<1x128xi1>
    %85 = vector.broadcast %84 : vector<1x128xi1> to vector<8x128xi1>
    %86 = vector.broadcast %cst_52 : f32 to vector<8x128xf32>
    %87 = arith.select %85, %83, %86 : vector<8x128xi1>, vector<8x128xf32>
    %cst_53 = arith.constant dense<0.000000e+00> : vector<8x128xf32>
    %88 = tpu.matmul %82, %87, %cst_53 {dimension_numbers = #tpu.dot_dimension_numbers<[1], [0], [0], [1], [0, 0, 1, 1], [], []>} : vector<8x8xf32>, vector<8x128xf32>, vector<8x128xf32> -> vector<8x128xf32>
    %c1_54 = arith.constant 1 : index
    %c0_55 = arith.constant 0 : index
    %c0_56 = arith.constant 0 : index
    %89 = vector.load %arg10[%c1_54, %c0_55, %c0_56] : memref<2x8x8xf32, #tpu.memory_space<vmem>>, vector<1x8x8xf32>
    %90 = vector.shape_cast %89 : vector<1x8x8xf32> to vector<8x8xf32>
    %cst_57 = arith.constant dense<0.000000e+00> : vector<8x128xf32>
    %91 = tpu.matmul %90, %80, %cst_57 {dimension_numbers = #tpu.dot_dimension_numbers<[1], [0], [0], [1], [0, 0, 1, 1], [], []>} : vector<8x8xf32>, vector<8x128xf32>, vector<8x128xf32> -> vector<8x128xf32>
    %92 = arith.addf %88, %91 : vector<8x128xf32>
    %c0_58 = arith.constant 0 : index
    %c0_59 = arith.constant 0 : index
    %93 = vector.load %arg11[%c0_58, %c0_59] : memref<8x1xf32, #tpu.memory_space<vmem>>, vector<8x1xf32>
    %94 = vector.broadcast %93 : vector<8x1xf32> to vector<8x128xf32>
    %95 = arith.addf %92, %94 : vector<8x128xf32>
    %cst_60 = arith.constant 0.000000e+00 : f32
    %96 = vector.broadcast %cst_60 : f32 to vector<8x128xf32>
    %97 = arith.maximumf %95, %96 : vector<8x128xf32>
    %98 = arith.addf %97, %63 : vector<8x128xf32>
    %cst_61 = arith.constant 0.000000e+00 : f32
    %99 = vector.broadcast %cst_61 : f32 to vector<8x128xf32>
    %100 = arith.maximumf %98, %99 : vector<8x128xf32>
    %101 = tpu.iota {dimensions = array<i32: 0>} : vector<128x2xi32>
    %102 = tpu.iota {dimensions = array<i32: 1>} : vector<128x2xi32>
    %c16_i32_62 = arith.constant 16 : i32
    %103 = vector.broadcast %c16_i32_62 : i32 to vector<128x2xi32>
    %104 = arith.muli %102, %103 : vector<128x2xi32>
    %c15_i32 = arith.constant 15 : i32
    %105 = vector.broadcast %c15_i32 : i32 to vector<128x2xi32>
    %106 = arith.addi %104, %105 : vector<128x2xi32>
    %107 = arith.cmpi eq, %101, %106 : vector<128x2xi32>
    %108 = arith.extui %107 : vector<128x2xi1> to vector<128x2xi32>
    %109 = arith.sitofp %108 : vector<128x2xi32> to vector<128x2xf32>
    %cst_63 = arith.constant dense<0.000000e+00> : vector<8x2xf32>
    %110 = tpu.matmul %100, %109, %cst_63 {dimension_numbers = #tpu.dot_dimension_numbers<[1], [0], [0], [1], [0, 0, 1, 1], [], []>} : vector<8x128xf32>, vector<128x2xf32>, vector<8x2xf32> -> vector<8x2xf32>
    %c0_64 = arith.constant 0 : index
    %c0_65 = arith.constant 0 : index
    %111 = vector.load %arg12[%c0_64, %c0_65] : memref<3x8xf32, #tpu.memory_space<vmem>>, vector<3x8xf32>
    %cst_66 = arith.constant dense<0.000000e+00> : vector<3x2xf32>
    %112 = tpu.matmul %111, %110, %cst_66 {dimension_numbers = #tpu.dot_dimension_numbers<[1], [0], [0], [1], [0, 0, 1, 1], [], []>} : vector<3x8xf32>, vector<8x2xf32>, vector<3x2xf32> -> vector<3x2xf32>
    %c0_67 = arith.constant 0 : index
    %c0_68 = arith.constant 0 : index
    %113 = vector.load %arg13[%c0_67, %c0_68] : memref<3x1xf32, #tpu.memory_space<vmem>>, vector<3x1xf32>
    %114 = vector.broadcast %113 : vector<3x1xf32> to vector<3x2xf32>
    %115 = arith.addf %112, %114 : vector<3x2xf32>
    %c0_69 = arith.constant 0 : index
    %c0_70 = arith.constant 0 : index
    %116 = vector.load %arg14[%c0_69, %c0_70] : memref<3x2xf32, #tpu.memory_space<vmem>>, vector<3x2xf32>
    tpu.vector_store %arg14[%c0_69, %c0_70], %115 {strides = array<i32>} : memref<3x2xf32, #tpu.memory_space<vmem>>, vector<3x2xf32>,
    return
  }
  func.func @transform_0(%arg0: i32) -> (i32, i32) {
    %c0_i32 = arith.constant 0 : i32
    %c0_i32_0 = arith.constant 0 : i32
    %c0_i32_1 = arith.constant 0 : i32
    return %c0_i32, %c0_i32_0 : i32, i32
  }
  func.func @transform_1(%arg0: i32) -> (i32, i32, i32) {
    %c0_i32 = arith.constant 0 : i32
    %c0_i32_0 = arith.constant 0 : i32
    %c0_i32_1 = arith.constant 0 : i32
    %c0_i32_2 = arith.constant 0 : i32
    return %c0_i32, %c0_i32_0, %c0_i32_1 : i32, i32, i32
  }
  func.func @transform_2(%arg0: i32) -> (i32, i32) {
    %c0_i32 = arith.constant 0 : i32
    %c0_i32_0 = arith.constant 0 : i32
    %c0_i32_1 = arith.constant 0 : i32
    return %c0_i32, %c0_i32_0 : i32, i32
  }
  func.func @transform_3(%arg0: i32) -> (i32, i32, i32) {
    %c0_i32 = arith.constant 0 : i32
    %c0_i32_0 = arith.constant 0 : i32
    %c0_i32_1 = arith.constant 0 : i32
    %c0_i32_2 = arith.constant 0 : i32
    return %c0_i32, %c0_i32_0, %c0_i32_1 : i32, i32, i32
  }
  func.func @transform_4(%arg0: i32) -> (i32, i32) {
    %c0_i32 = arith.constant 0 : i32
    %c0_i32_0 = arith.constant 0 : i32
    %c0_i32_1 = arith.constant 0 : i32
    return %c0_i32, %c0_i32_0 : i32, i32
  }
  func.func @transform_5(%arg0: i32) -> (i32, i32) {
    %c0_i32 = arith.constant 0 : i32
    %c0_i32_0 = arith.constant 0 : i32
    %c0_i32_1 = arith.constant 0 : i32
    return %c0_i32, %c0_i32_0 : i32, i32
  }
  func.func @transform_6(%arg0: i32) -> (i32, i32) {
    %c0_i32 = arith.constant 0 : i32
    %c0_i32_0 = arith.constant 0 : i32
    %c0_i32_1 = arith.constant 0 : i32
    return %c0_i32, %c0_i32_0 : i32, i32
  }
  func.func @transform_7(%arg0: i32) -> (i32, i32, i32) {
    %c0_i32 = arith.constant 0 : i32
    %c0_i32_0 = arith.constant 0 : i32
    %c0_i32_1 = arith.constant 0 : i32
    %c0_i32_2 = arith.constant 0 : i32
    return %c0_i32, %c0_i32_0, %c0_i32_1 : i32, i32, i32
  }
  func.func @transform_8(%arg0: i32) -> (i32, i32) {
    %c0_i32 = arith.constant 0 : i32
    %c0_i32_0 = arith.constant 0 : i32
    %c0_i32_1 = arith.constant 0 : i32
    return %c0_i32, %c0_i32_0 : i32, i32
  }
  func.func @transform_9(%arg0: i32) -> (i32, i32, i32) {
    %c0_i32 = arith.constant 0 : i32
    %c0_i32_0 = arith.constant 0 : i32
    %c0_i32_1 = arith.constant 0 : i32
    %c0_i32_2 = arith.constant 0 : i32
    return %c0_i32, %c0_i32_0, %c0_i32_1 : i32, i32, i32
  }
  func.func @transform_10(%arg0: i32) -> (i32, i32) {
    %c0_i32 = arith.constant 0 : i32
    %c0_i32_0 = arith.constant 0 : i32
    %c0_i32_1 = arith.constant 0 : i32
    return %c0_i32, %c0_i32_0 : i32, i32
  }
  func.func @transform_11(%arg0: i32) -> (i32, i32) {
    %c0_i32 = arith.constant 0 : i32
    %c0_i32_0 = arith.constant 0 : i32
    %c0_i32_1 = arith.constant 0 : i32
    return %c0_i32, %c0_i32_0 : i32, i32
  }
  func.func @transform_12(%arg0: i32) -> (i32, i32) {
    %c0_i32 = arith.constant 0 : i32
    %c0_i32_0 = arith.constant 0 : i32
    %c0_i32_1 = arith.constant 0 : i32
    return %c0_i32, %c0_i32_0 : i32, i32
  }
  func.func @transform_13(%arg0: i32) -> (i32, i32) {
    %c0_i32 = arith.constant 0 : i32
    %c0_i32_0 = arith.constant 0 : i32
    %c0_i32_1 = arith.constant 0 : i32
    return %c0_i32, %c0_i32_0 : i32, i32
  }
}

</mosaic_0001>

<bundles_post_ra>
// kernel: tpu_custom_call.1
= control target key start
LH: loop header
LB: loop body
LE: loop exit
PB: predicated region body
PF: predicated region fallthrough
CT: control target
= control target key end

     0   :  { %vm73_vm0 = vcmask 1043456   ;;  %vm69_vm1 = vcmask 31744   ;;  %v1228_v1 = vmov 0.0   ;;  %vm1229_vm2 = vmmov 0   ;;  %s1230_s29 = smov 1   ;;  %s1478_s0 = inlined_call_operand.vmem [shape: f32[4,128], index: 0, kind: input, shape index: {}]   ;;  %s1479_s1 = inlined_call_operand.vmem [shape: f32[2,8,4], index: 1, kind: input, shape index: {}]   ;;  %s1480_s2 = inlined_call_operand.vmem [shape: f32[8,1], index: 2, kind: input, shape index: {}]   ;;  %s1481_s3 = inlined_call_operand.vmem [shape: f32[2,8,8], index: 3, kind: input, shape index: {}]   ;;  %s1482_s4 = inlined_call_operand.vmem [shape: f32[8,1], index: 4, kind: input, shape index: {}]   ;;  %s1483_s6 = inlined_call_operand.vmem [shape: f32[8,1], index: 6, kind: input, shape index: {}]   ;;  %s1484_s8 = inlined_call_operand.vmem [shape: f32[8,1], index: 8, kind: input, shape index: {}]   ;;  %s1485_s10 = inlined_call_operand.vmem [shape: f32[8,1], index: 10, kind: input, shape index: {}]   ;;  %s1486_s5 = inlined_call_operand.vmem [shape: f32[8,4], index: 5, kind: input, shape index: {}]   ;;  %s1487_s7 = inlined_call_operand.vmem [shape: f32[2,8,8], index: 7, kind: input, shape index: {}]   ;;  %s1488_s9 = inlined_call_operand.vmem [shape: f32[2,8,8], index: 9, kind: input, shape index: {}]   ;;  %s1489_s12 = inlined_call_operand.vmem [shape: f32[3,1], index: 12, kind: input, shape index: {}]   ;;  %s1490_s11 = inlined_call_operand.vmem [shape: f32[3,8], index: 11, kind: input, shape index: {}]   ;;  %s1491_s13 = inlined_call_operand.vmem [shape: f32[3,2], index: 13, kind: output, shape index: {}]  }
   0x1   :  { %v1308_v0 = vld [vmem:[%s1478_s0] sm:$0xf]  ;;  %1110 = vmatprep.subr.mxu0 %v1228_v1  ;;  %1112 = vmatprep.mubr.msk.f32.mxu0 %vm1229_vm2, %v1228_v1  ;;  %v1021_v2 = vld [vmem:[%s1479_s1 + $0x8] sm:$0xff]  ;;  %v1231_v4 = vmov 0   ;;  %v44_v5 = vlaneseq  ;;  %vm237_vm4 = vcmask 64512   ;;  %v1233_v60 = vmov 0.0|0.0  }
   0x2   :  { %62 = vrot.lane.b32.xlu0 %v1308_v0, %s1230_s29  ;;  %1111 = vmatpush3.msk.msra.mxu0 %vm73_vm0, %v1308_v0  ;;  %v223_v3 = vld [vmem:[%s1480_s2] sm:$0xff]  ;;  %v1026_v20 = vld [vmem:[%s1481_s3 + $0x8] sm:$0xff] }
   0x3   :  { %1113 = vmatmul.mubr.msk.f32.vlgmr.msra.gmra.mrb[0].mxu0 %vm69_vm1, %v1021_v2  ;;  %1115 = vmatprep.subr.mxu0 %v1228_v1  ;;  %v1331_v6 = vand.u32 127, %v44_v5  ;;  %v61_v9 = vld [vmem:[%s1479_s1] sm:$0xff]  ;;  %v1032_v42 = vld [vmem:[%s1487_s7 + $0x8] sm:$0xff]  ;;  %v1419_v56 = vshrl.u32 %v44_v5, 7  ;;  %v1234_v2 = vmov 1.0|1.0  }
   0x4   :  { %1117 = vmatprep.mubr.msk.f32.mxu0 %vm1229_vm2, %v1228_v1  ;;  %1226 = vset.pattern.permute.xlu0 %v1231_v4  ;;  %v384_v21 = vld [vmem:[%s1482_s4] sm:$0xff]  ;;  %v1036_v55 = vld [vmem:[%s1488_s9 + $0x8] sm:$0xff] }
   0x5   :  { %1227 = vset.pattern.permute.xlu1 %v1231_v4  ;;  %1145 = vmatprep.subr.mxu1 %v1228_v1  ;;  %v50_v7 = vand.u32 15, %v1331_v6  ;;  %v393_v22 = vld [vmem:[%s1483_s6] sm:$0xff]  ;;  %v815_v51 = vmul.u32 16, %v1331_v6  ;;  %v800_v59 = vadd.s32 8, %v1419_v56  ;;  %v801_v61 = vadd.s32 16, %v1419_v56 }
   0x6   :  { %226 = vperm.xlu0 %1226, %v223_v3   ;;  %1147 = vmatprep.mubr.msk.f32.mxu1 %vm1229_vm2, %v1228_v1  ;;  %v628_v23 = vld [vmem:[%s1484_s8] sm:$0xff]  ;;  %v802_v62 = vadd.s32 24, %v1419_v56  ;;  %v803_v63 = vadd.s32 32, %v1419_v56  ;;  %v805_v3 = vadd.s32 48, %v1419_v56  ;;  %v806_v4 = vadd.s32 56, %v1419_v56 }
   0x7   :  { %vm1336_vm3 = vcmp.ge.s32.totalorder %v50_v7, 1  ;;  %v788_v24 = vld [vmem:[%s1485_s10] sm:$0xff]  ;;  %s1232_s10 = smov 2   ;;  %vm1401_vm5 = vcmp.ge.s32.totalorder %v50_v7, 2  ;;  %v1421_v57 = vadd.s32 15, %v815_v51  ;;  %v807_v5 = vadd.s32 64, %v1419_v56 }
   0x8   :  { %v231_v25 = vld [vmem:[%s1481_s3] sm:$0xff]  ;;  %v808_v6 = vadd.s32 72, %v1419_v56 }
   0x9   :  { %v392_v27 = vld [vmem:[%s1486_s5] sm:$0xff]  ;;  %vm817_vm6 = vcmp.eq.s32.totalorder %v1419_v56, %v1421_v57  ;;  %vm818_vm7 = vcmp.eq.s32.totalorder %v800_v59, %v1421_v57  ;;  %vm819_vm9 = vcmp.eq.s32.totalorder %v801_v61, %v1421_v57  ;;  %vm820_vm10 = vcmp.eq.s32.totalorder %v802_v62, %v1421_v57 }
   0xa   :  { %v474_v44 = vld [vmem:[%s1487_s7] sm:$0xff]  ;;  %vm1196_vm8 = vmpackc.low %vm818_vm7, %vm817_vm6  ;;  %vm821_vm12 = vcmp.eq.s32.totalorder %v803_v63, %v1421_v57  ;;  %vm823_vm15 = vcmp.eq.s32.totalorder %v805_v3, %v1421_v57  ;;  %vm826_vm6 = vcmp.eq.s32.totalorder %v808_v6, %v1421_v57 }
   0xb   :  { %v936_v58 = vld [vmem:[%s1489_s12] sm:$0x7]  ;;  %vm1199_vm11 = vmpackc.low %vm820_vm10, %vm819_vm9 }
   0xc   :  { %v636_v7 = vld [vmem:[%s1488_s9] sm:$0xff] }
  0x74   :  { %v63_v10 = vpop.permute.xlu0 %62 }
  0x75   :  { %v66_v11 = vsel %vm1336_vm3, %v63_v10, 0.0  ;;  %v810_v10 = vadd.s32 88, %v1419_v56 }
  0x76   :  { %1116 = vmatpush3.msk.msra.mxu0 %vm73_vm0, %v66_v11  ;;  %v811_v11 = vadd.s32 96, %v1419_v56 }
  0x77   :  { %1118 = vmatmul.mubr.msk.f32.vlgmr.msra.gmra.mrb[2].mxu0 %vm69_vm1, %v61_v9  ;;  %1120 = vmatprep.subr.mxu0 %v1228_v1  ;;  %v809_v9 = vadd.s32 80, %v1419_v56  ;;  %vm828_vm9 = vcmp.eq.s32.totalorder %v810_v10, %v1421_v57 }
  0x78   :  { %1122 = vmatprep.mubr.msk.f32.mxu0 %vm1229_vm2, %v1228_v1 }
  0x85   :  { %v227_v15 = vpop.permute.xlu0 %226 }
  0xd6   :  { %v143_v12 = vpop.f32.mrb[0].mxu0 }
  0xd7   :  { %v1114_v13 = vpop.f32.mrb[1].mxu0 }
  0xd8   :  { %v814_v13 = vadd.s32 120, %v1419_v56 }
 0x14a   :  { %v219_v14 = vpop.f32.mrb[2].mxu0 }
 0x14b   :  { %v220_v16 = vadd.f32 %v219_v14, %v143_v12  ;;  %v1119_v17 = vpop.f32.mrb[3].mxu0  ;;  %v812_v12 = vadd.s32 104, %v1419_v56 }
 0x14d   :  { %v229_v18 = vadd.f32 %v227_v15, %v220_v16 }
 0x14f   :  { %v230_v19 = vmax.f32 %v229_v18, 0.0 }
 0x151   :  { %232 = vrot.lane.b32.xlu1 %v230_v19, %s1230_s29  ;;  %1121 = vmatpush3.msra.mxu0 %v230_v19 }
 0x152   :  { %1123 = vmatmul.mubr.msk.f32.vlgmr.msra.gmra.mrb[4].mxu0 %vm237_vm4, %v1026_v20  ;;  %1125 = vmatprep.subr.mxu0 %v1228_v1 }
 0x153   :  { %1127 = vmatprep.mubr.msk.f32.mxu0 %vm1229_vm2, %v1228_v1 }
 0x155   :  { %387 = vperm.xlu1 %1227, %v384_v21  }
 0x159   :  { %396 = vperm.xlu1 %1227, %v393_v22  }
 0x15d   :  { %631 = vperm.xlu1 %1227, %v628_v23  }
 0x161   :  { %791 = vperm.xlu1 %1227, %v788_v24   ;;  %v935_v24 = vld [vmem:[%s1490_s11] sm:$0x7] }
 0x1c3   :  { %v233_v26 = vpop.permute.xlu1 %232 }
 0x1c4   :  { %1126 = vmatpush3.msk.msra.mxu0 %vm1336_vm3, %v233_v26  ;;  %vm825_vm3 = vcmp.eq.s32.totalorder %v807_v5, %v1421_v57 }
 0x1c5   :  { %1128 = vmatmul.mubr.msk.f32.vlgmr.msra.gmra.mrb[6].mxu0 %vm237_vm4, %v231_v25  ;;  %1130 = vmatprep.subr.mxu0 %v1228_v1  ;;  %vm1208_vm7 = vmpackc.low %vm826_vm6, %vm825_vm3 }
 0x1c6   :  { %1131 = vmatpush3.msk.msra.mxu0 %vm73_vm0, %v1308_v0  ;;  %1132 = vmatprep.mubr.msk.f32.mxu0 %vm1229_vm2, %v1228_v1  ;;  %v804_v0 = vadd.s32 40, %v1419_v56  ;;  %vm824_vm0 = vcmp.eq.s32.totalorder %v806_v4, %v1421_v57 }
 0x1c7   :  { %1135 = vmatprep.subr.mxu0 %v1228_v1 }
 0x1c8   :  { %vm822_vm13 = vcmp.eq.s32.totalorder %v804_v0, %v1421_v57 }
 0x1c9   :  { %1133 = vmatmul.mubr.msk.f32.vlgmr.msra.gmra.mrb[8].mxu0 %vm69_vm1, %v392_v27  ;;  %vm1202_vm14 = vmpackc.low %vm822_vm13, %vm821_vm12  ;;  %vm832_vm13 = vcmp.eq.s32.totalorder %v814_v13, %v1421_v57 }
 0x1ca   :  { %1137 = vmatprep.mubr.msk.f32.mxu0 %vm1229_vm2, %v1228_v1  ;;  %vm1205_vm1 = vmpackc.low %vm824_vm0, %vm823_vm15  ;;  %vm1015_vm15 = vcmask 10240  }
 0x1d4   :  { %v388_v30 = vpop.permute.xlu1 %387 }
 0x1d8   :  { %v397_v35 = vpop.permute.xlu1 %396 }
 0x1dc   :  { %v632_v52 = vpop.permute.xlu1 %631 }
 0x1e0   :  { %v792_v19 = vpop.permute.xlu1 %791 }
 0x225   :  { %v307_v28 = vpop.f32.mrb[4].mxu0 }
 0x226   :  { %v1124_v29 = vpop.f32.mrb[5].mxu0 }
 0x298   :  { %v380_v31 = vpop.f32.mrb[6].mxu0 }
 0x299   :  { %v381_v32 = vadd.f32 %v380_v31, %v307_v28  ;;  %v1129_v33 = vpop.f32.mrb[7].mxu0 }
 0x29b   :  { %v390_v34 = vadd.f32 %v388_v30, %v381_v32 }
 0x29c   :  { %v468_v36 = vpop.f32.mrb[8].mxu0 }
 0x29d   :  { %v391_v37 = vmax.f32 %v390_v34, 0.0  ;;  %v469_v38 = vadd.f32 %v468_v36, %v397_v35  ;;  %v1134_v39 = vpop.f32.mrb[9].mxu0 }
 0x29f   :  { %v472_v40 = vadd.f32 %v469_v38, %v391_v37 }
 0x2a1   :  { %v1388_v41 = vmax.f32 %v472_v40, 0.0 }
 0x2a3   :  { %475 = vrot.lane.b32.xlu0 %v1388_v41, %s1232_s10  ;;  %1136 = vmatpush3.msra.mxu0 %v1388_v41 }
 0x2a4   :  { %1138 = vmatmul.mubr.msk.f32.vlgmr.msra.gmra.mrb[10].mxu0 %vm237_vm4, %v1032_v42  ;;  %1140 = vmatprep.subr.mxu0 %v1228_v1 }
 0x2a5   :  { %1142 = vmatprep.mubr.msk.f32.mxu0 %vm1229_vm2, %v1228_v1 }
 0x315   :  { %v476_v45 = vpop.permute.xlu0 %475 }
 0x316   :  { %1141 = vmatpush3.msk.msra.mxu0 %vm1401_vm5, %v476_v45 }
 0x317   :  { %1143 = vmatmul.mubr.msk.f32.vlgmr.msra.gmra.mrb[12].mxu0 %vm237_vm4, %v474_v44  ;;  %1150 = vmatprep.subr.mxu0 %v1228_v1 }
 0x318   :  { %1152 = vmatprep.mubr.msk.f32.mxu0 %vm1229_vm2, %v1228_v1 }
 0x377   :  { %v551_v46 = vpop.f32.mrb[10].mxu0 }
 0x378   :  { %v1139_v47 = vpop.f32.mrb[11].mxu0 }
 0x3ea   :  { %v624_v48 = vpop.f32.mrb[12].mxu0 }
 0x3eb   :  { %v625_v49 = vadd.f32 %v624_v48, %v551_v46  ;;  %v1144_v50 = vpop.f32.mrb[13].mxu0 }
 0x3ed   :  { %v634_v53 = vadd.f32 %v632_v52, %v625_v49 }
 0x3ef   :  { %v635_v54 = vmax.f32 %v634_v53, 0.0 }
 0x3f1   :  { %637 = vrot.lane.b32.xlu0 %v635_v54, %s1232_s10  ;;  %1146 = vmatpush3.msra.mxu1 %v635_v54 }
 0x3f2   :  { %1148 = vmatmul.mubr.msk.f32.vlgmr.msra.gmra.mrb[0].mxu1 %vm237_vm4, %v1036_v55  ;;  %1195 = vmatprep.subr.bf16.mxu1 %v1233_v60 }
 0x3f3   :  { %1187 = vmatprep.mubr.msk.f32.mxu1 %vm1229_vm2, %v1228_v1  ;;  %1197 = vmatpush3.bf16.msk.msra.mxu1 %vm1196_vm8, %v1234_v2  ;;  %vm827_vm8 = vcmp.eq.s32.totalorder %v809_v9, %v1421_v57 }
 0x3f4   :  { %1198 = vmatprep.subr.bf16.mxu1 %v1233_v60  ;;  %vm1211_vm10 = vmpackc.low %vm828_vm9, %vm827_vm8 }
 0x3f5   :  { %939 = vperm.xlu0 %1226, %v936_v58  }
 0x3f7   :  { %1200 = vmatpush3.bf16.msk.msra.mxu1 %vm1199_vm11, %v1234_v2  ;;  %vm830_vm11 = vcmp.eq.s32.totalorder %v812_v12, %v1421_v57 }
 0x3f8   :  { %1201 = vmatprep.subr.bf16.mxu1 %v1233_v60 }
 0x3fb   :  { %1203 = vmatpush3.bf16.msk.msra.mxu1 %vm1202_vm14, %v1234_v2 }
 0x3fc   :  { %1204 = vmatprep.subr.bf16.mxu1 %v1233_v60 }
 0x3ff   :  { %1206 = vmatpush3.bf16.msk.msra.mxu1 %vm1205_vm1, %v1234_v2 }
 0x400   :  { %1207 = vmatprep.subr.bf16.mxu1 %v1233_v60 }
 0x403   :  { %1209 = vmatpush3.bf16.msk.msra.mxu1 %vm1208_vm7, %v1234_v2 }
 0x404   :  { %1210 = vmatprep.subr.bf16.mxu1 %v1233_v60 }
 0x407   :  { %1212 = vmatpush3.bf16.msk.msra.mxu1 %vm1211_vm10, %v1234_v2 }
 0x408   :  { %1213 = vmatprep.subr.bf16.mxu1 %v1233_v60 }
 0x463   :  { %v638_v8 = vpop.permute.xlu0 %637 }
 0x464   :  { %1151 = vmatpush3.msk.msra.mxu0 %vm1401_vm5, %v638_v8  ;;  %vm829_vm5 = vcmp.eq.s32.totalorder %v811_v11, %v1421_v57 }
 0x465   :  { %1153 = vmatmul.mubr.msk.f32.vlgmr.msra.gmra.mrb[14].mxu0 %vm237_vm4, %v636_v7  ;;  %1190 = vmatprep.subr.mxu0 %v1228_v1 }
 0x466   :  { %1192 = vmatprep.mubr.msk.f32.mxu0 %vm1229_vm2, %v1228_v1  ;;  %vm1214_vm2 = vmpackc.low %vm830_vm11, %vm829_vm5  ;;  %v813_v1 = vadd.s32 112, %v1419_v56 }
 0x467   :  { %1215 = vmatpush3.bf16.msk.msra.mxu1 %vm1214_vm2, %v1234_v2 }
 0x468   :  { %1216 = vmatprep.subr.bf16.mxu1 %v1233_v60  ;;  %vm831_vm12 = vcmp.eq.s32.totalorder %v813_v1, %v1421_v57 }
 0x469   :  { %vm1217_vm14 = vmpackc.low %vm832_vm13, %vm831_vm12 }
 0x46b   :  { %1218 = vmatpush3.bf16.msk.msra.mxu1 %vm1217_vm14, %v1234_v2 }
 0x474   :  { %v940_v27 = vpop.permute.xlu0 %939 }
 0x4c5   :  { %v711_v14 = vpop.f32.mrb[0].mxu1 }
 0x4c6   :  { %v1149_v15 = vpop.f32.mrb[1].mxu1 }
 0x538   :  { %v784_v16 = vpop.f32.mrb[14].mxu0 }
 0x539   :  { %v785_v17 = vadd.f32 %v784_v16, %v711_v14  ;;  %v1154_v18 = vpop.f32.mrb[15].mxu0 }
 0x53b   :  { %v794_v20 = vadd.f32 %v792_v19, %v785_v17 }
 0x53d   :  { %v795_v21 = vmax.f32 %v794_v20, 0.0 }
 0x53f   :  { %v796_v22 = vadd.f32 %v795_v21, %v1388_v41 }
 0x541   :  { %v797_v23 = vmax.f32 %v796_v22, 0.0 }
 0x543   :  { %1188 = vmatmul.mubr.f32.vlgmr.msra.gmra.mrb[2].mxu1 %v797_v23 }
 0x616   :  { %v931_v25 = vpop.f32.mrb[2].mxu1 }
 0x617   :  { %v1189_v26 = vpop.f32.mrb[3].mxu1  ;;  %1191 = vmatpush3.msra.mxu0 %v931_v25 }
 0x618   :  { %1193 = vmatmul.mubr.msk.f32.vlgmr.msra.gmra.mrb[16].mxu0 %vm237_vm4, %v935_v24 }
 0x6eb   :  { %v1011_v28 = vpop.f32.mrb[16].mxu0 }
 0x6ec   :  { %v1012_v29 = vadd.f32 %v1011_v28, %v940_v27  ;;  %v1194_v30 = vpop.f32.mrb[17].mxu0 }
 0x6ee   :  { %1016 = vst.msk [vmem:[%s1491_s13] sm:$0x7] %vm1015_vm15, %v1012_v29 }

</bundles_post_ra>
